<compile_context>
chip_gen: v7x
topology: tpu7x:2x2x1
jax: 0.10.0
libtpu: 0.0.40
codegen_flags: <defaults>
</compile_context>

<pallas_src>
import functools

import jax
import jax.numpy as jnp
from jax.experimental import pallas as pl
from jax.experimental.pallas import tpu as pltpu


# --------------------------------------------------------------------------- #
# Single-pass kernel: one (TB, C, T) slab per grid step.
# --------------------------------------------------------------------------- #
def _se_kernel(x_ref, w1_ref, b1_ref, w2_ref, b2_ref, o_ref, *, inv_t):
    # --- squeeze: mean over T (lane axis). f32 accumulation; the XLU reduce
    # rides a free slot in this HBM-bound kernel.
    mean = jnp.sum(x_ref[...].astype(jnp.float32), axis=-1) * inv_t      # (TB, C)

    # --- excitation: 1x1 conv -> ReLU -> 1x1 conv -> Sigmoid
    w1 = w1_ref[...]                                                     # (C, bneck)
    h = jnp.dot(mean.astype(w1.dtype), w1, preferred_element_type=jnp.float32)
    h = jnp.maximum(h + b1_ref[...].astype(jnp.float32), 0.0)            # (TB, bneck)
    w2 = w2_ref[...]                                                     # (bneck, C)
    s = jnp.dot(h.astype(w2.dtype), w2, preferred_element_type=jnp.float32)
    gate = jax.nn.sigmoid(s + b2_ref[...].astype(jnp.float32))           # (TB, C)

    # --- scale: re-read x_ref here so the block is not kept live as a value
    # across the matmuls (lets Mosaic issue the loads next to the multiply).
    x = x_ref[...]
    o_ref[...] = (x * gate.astype(x.dtype)[:, :, None]).astype(o_ref.dtype)


# --------------------------------------------------------------------------- #
# Two-pass fallback kernels (only used when a (1, C, T) slab doesn't fit VMEM).
# --------------------------------------------------------------------------- #
def _mean_kernel(x_ref, mean_ref, *, inv_t):
    t = pl.program_id(1)

    @pl.when(t == 0)
    def _():
        mean_ref[...] = jnp.zeros_like(mean_ref)

    mean_ref[...] += jnp.sum(x_ref[...].astype(jnp.float32), axis=-1, keepdims=True)

    @pl.when(t == pl.num_programs(1) - 1)
    def _():
        mean_ref[...] *= inv_t


def _scale_kernel(mean_ref, w1_ref, b1_ref, w2_ref, b2_ref, x_ref, o_ref):
    # Gate is tiny; recomputing it per T-tile hides entirely under the DMA.
    m = mean_ref[...].reshape(1, mean_ref.shape[1])                      # (1, C) f32
    w1 = w1_ref[...]
    h = jnp.dot(m.astype(w1.dtype), w1, preferred_element_type=jnp.float32)
    h = jnp.maximum(h + b1_ref[...].astype(jnp.float32), 0.0)
    w2 = w2_ref[...]
    s = jnp.dot(h.astype(w2.dtype), w2, preferred_element_type=jnp.float32)
    gate = jax.nn.sigmoid(s + b2_ref[...].astype(jnp.float32))           # (1, C)

    x = x_ref[...]                                                       # (1, C, tt)
    o_ref[...] = (x * gate.astype(x.dtype)[:, :, None]).astype(o_ref.dtype)


# --------------------------------------------------------------------------- #
# Wrappers
# --------------------------------------------------------------------------- #
def _vmem_capacity_bytes():
    """Generation-aware VMEM capacity (128 MiB v5e/v6e, 64 MiB per-TC v7x)."""
    try:
        cap = int(pltpu.get_tpu_info().vmem_capacity_bytes)
        if cap > 0:
            return cap
    except Exception:
        pass
    return 64 << 20  # conservative floor: safe on every generation


def _se_module_two_pass(x, w1_t, b1_2d, w2_t, b2_2d, *, usable_vmem, param_bytes):
    """T-tiled two-pass form for slabs too large for single-pass VMEM residency."""
    B, C, T = x.shape
    bneck = w1_t.shape[1]
    itemsize = jnp.dtype(x.dtype).itemsize

    # T tile: multiple of 128 whose double-buffered in+out blocks (+ f32 upcast
    # transient for the reduce) fit the usable VMEM.
    tt_budget = max(1 << 20, (usable_vmem - 2 * param_bytes - (4 << 20)) // 6)
    tt = max(128, (tt_budget // (C * itemsize)) // 128 * 128)
    t_pad_min = ((T + 127) // 128) * 128
    tt = min(tt, t_pad_min)
    t_pad = ((T + tt - 1) // tt) * tt
    nt = t_pad // tt

    # Zero padding keeps the sum exact; 1/T uses the original length.
    x_p = x if t_pad == T else jnp.pad(x, ((0, 0), (0, 0), (0, t_pad - T)))
    inv_t = float(1.0 / T)

    means = pl.pallas_call(
        functools.partial(_mean_kernel, inv_t=inv_t),
        out_shape=jax.ShapeDtypeStruct((B, C, 1), jnp.float32),
        grid_spec=pltpu.PrefetchScalarGridSpec(
            num_scalar_prefetch=0,
            grid=(B, nt),
            in_specs=[pl.BlockSpec((1, C, tt), lambda b, t: (b, 0, t))],
            out_specs=pl.BlockSpec((1, C, 1), lambda b, t: (b, 0, 0)),
        ),
        compiler_params=pltpu.CompilerParams(
            dimension_semantics=("parallel", "arbitrary"),
            vmem_limit_bytes=int(usable_vmem),
        ),
        cost_estimate=pl.CostEstimate(
            flops=int(B * C * T),
            transcendentals=0,
            bytes_accessed=int(B * C * t_pad * itemsize + B * C * 4),
        ),
    )(x_p)

    out_p = pl.pallas_call(
        _scale_kernel,
        out_shape=jax.ShapeDtypeStruct((B, C, t_pad), x.dtype),
        grid_spec=pltpu.PrefetchScalarGridSpec(
            num_scalar_prefetch=0,
            grid=(B, nt),
            in_specs=[
                pl.BlockSpec((1, C, 1), lambda b, t: (b, 0, 0)),
                pl.BlockSpec((C, bneck), lambda b, t: (0, 0)),
                pl.BlockSpec((1, bneck), lambda b, t: (0, 0)),
                pl.BlockSpec((bneck, C), lambda b, t: (0, 0)),
                pl.BlockSpec((1, C), lambda b, t: (0, 0)),
                pl.BlockSpec((1, C, tt), lambda b, t: (b, 0, t)),
            ],
            out_specs=pl.BlockSpec((1, C, tt), lambda b, t: (b, 0, t)),
        ),
        compiler_params=pltpu.CompilerParams(
            dimension_semantics=("parallel", "parallel"),
            vmem_limit_bytes=int(usable_vmem),
        ),
        cost_estimate=pl.CostEstimate(
            flops=int(B * C * T + 4 * B * C * bneck * nt),
            transcendentals=int(B * C * nt),
            bytes_accessed=int(2 * B * C * t_pad * itemsize + param_bytes),
        ),
    )(means, w1_t, b1_2d, w2_t, b2_2d, x_p)

    return out_p if t_pad == T else out_p[:, :, :T]


def se_module(x, w1, b1, w2, b2, *, block_budget_bytes=None, min_grid_steps=4):
    """x: (B, C, T); w1: (bottleneck, C); b1: (bottleneck,);
    w2: (C, bottleneck); b2: (C,). Returns (B, C, T)."""
    B, C, T = x.shape
    bneck = w1.shape[0]
    itemsize = jnp.dtype(x.dtype).itemsize

    # Pre-transpose conv weights so the kernel does plain row-major matmuls.
    # (Weights stay in the reference dtype; the MXU is nowhere near the
    #  bottleneck here, so a bf16 cast would only cost parity.)
    w1_t = jnp.transpose(w1)                    # (C, bneck)
    w2_t = jnp.transpose(w2)                    # (bneck, C)
    b1_2d = b1.reshape(1, bneck)
    b2_2d = b2.reshape(1, C)
    param_bytes = int(
        (w1_t.size + b1_2d.size + w2_t.size + b2_2d.size)
        * jnp.dtype(w1.dtype).itemsize
    )

    # Generation-aware VMEM budget (leave 25% headroom + internal scratch).
    vmem_cap = _vmem_capacity_bytes()
    usable = int(vmem_cap * 3 // 4)
    # Double-buffered in + out blocks (4x); +2x f32 upcast transient for the
    # reduce when the input is sub-32-bit.
    upcast = 0 if itemsize >= 4 else 1
    denom = 4 + 2 * upcast
    if block_budget_bytes is None:
        block_budget_bytes = max(1 << 20,
                                 (usable - 2 * param_bytes - (4 << 20)) // denom)

    # Batch block: cap TB so the grid has >= min_grid_steps steps (pipelining,
    # and megacore sharding of the "parallel" axis on v7x), then take the
    # largest divisor of B whose slab fits the per-block budget.
    per_batch_bytes = C * T * itemsize
    tb_cap = max(1, B // max(1, min_grid_steps))
    tb = 0
    for cand in range(tb_cap, 0, -1):
        if B % cand == 0 and cand * per_batch_bytes <= block_budget_bytes:
            tb = cand
            break

    if tb == 0:
        # Even a single-batch slab does not fit: T-tiled two-pass fallback
        # (2 reads + 1 write of x instead of 1+1, but it compiles and runs).
        return _se_module_two_pass(x, w1_t, b1_2d, w2_t, b2_2d,
                                   usable_vmem=usable, param_bytes=param_bytes)

    block_bytes = tb * per_batch_bytes
    vmem_limit = int(min(
        usable,
        max(denom * block_bytes + 2 * param_bytes + (4 << 20), 16 << 20),
    ))

    cost = pl.CostEstimate(
        flops=int(2 * B * C * T + 4 * B * C * bneck),
        transcendentals=int(B * C),
        bytes_accessed=int(2 * B * C * T * itemsize + param_bytes),
    )

    kernel = functools.partial(_se_kernel, inv_t=float(1.0 / T))
    grid = (B // tb,)
    return pl.pallas_call(
        kernel,
        out_shape=jax.ShapeDtypeStruct((B, C, T), x.dtype),
        grid_spec=pltpu.PrefetchScalarGridSpec(
            num_scalar_prefetch=0,
            grid=grid,
            in_specs=[
                pl.BlockSpec((tb, C, T), lambda b: (b, 0, 0)),
                pl.BlockSpec((C, bneck), lambda b: (0, 0)),
                pl.BlockSpec((1, bneck), lambda b: (0, 0)),
                pl.BlockSpec((bneck, C), lambda b: (0, 0)),
                pl.BlockSpec((1, C), lambda b: (0, 0)),
            ],
            out_specs=pl.BlockSpec((tb, C, T), lambda b: (b, 0, 0)),
        ),
        compiler_params=pltpu.CompilerParams(
            dimension_semantics=("parallel",),
            vmem_limit_bytes=vmem_limit,
        ),
        cost_estimate=cost,
    )(x, w1_t, b1_2d, w2_t, b2_2d)


def se_module_ref(x, w1, b1, w2, b2):
    """Pure-JAX reference mirroring the PyTorch module."""
    mean = jnp.mean(x, axis=2)                              # (B, C)
    h = jnp.maximum(mean @ w1.T + b1, 0.0)                  # (B, bottleneck)
    s = jax.nn.sigmoid(h @ w2.T + b2)                       # (B, C)
    return x * s[:, :, None]


if __name__ == "__main__":
    B, C, T = 2, 16, 128
    bottleneck = 32

    key = jax.random.PRNGKey(0)
    kx, k1, k2, k3, k4 = jax.random.split(key, 5)

    x = jax.random.normal(kx, (B, C, T), dtype=jnp.float32)
    # Deterministic synthetic parameters (Conv1d k=1 weights squeezed to 2-D).
    w1 = jax.random.normal(k1, (bottleneck, C), dtype=jnp.float32) * 0.1
    b1 = jax.random.normal(k2, (bottleneck,), dtype=jnp.float32) * 0.1
    w2 = jax.random.normal(k3, (C, bottleneck), dtype=jnp.float32) * 0.1
    b2 = jax.random.normal(k4, (C,), dtype=jnp.float32) * 0.1

    out = se_module(x, w1, b1, w2, b2)
    out = jax.block_until_ready(out)

    ref = se_module_ref(x, w1, b1, w2, b2)
    assert out.shape == (B, C, T)
    assert jnp.allclose(out, ref, atol=1e-5, rtol=1e-5)

    print("KERNEL_OK")
</pallas_src>

<mosaic_0001>
module attributes {stable_mosaic.version = 11 : i64} {
  func.func @_se_kernel(%arg0: i32, %arg1: memref<1x16x128xf32, #tpu.memory_space<vmem>>, %arg2: memref<16x32xf32, #tpu.memory_space<vmem>>, %arg3: memref<1x32xf32, #tpu.memory_space<vmem>>, %arg4: memref<32x16xf32, #tpu.memory_space<vmem>>, %arg5: memref<1x16xf32, #tpu.memory_space<vmem>>, %arg6: memref<1x16x128xf32, #tpu.memory_space<vmem>>) attributes {dimension_semantics = [#tpu.dimension_semantics<parallel>], iteration_bounds = array<i64: 2>, scalar_prefetch = 0 : i64, scratch_operands = 0 : i64, tpu.core_type = #tpu.core_type<tc>, window_params = [{transform_indices = @transform_0, window_bounds = array<i64: 1, 16, 128>}, {pipeline_mode = #tpu.pipeline_mode<synchronous>, transform_indices = @transform_1, window_bounds = array<i64: 16, 32>}, {pipeline_mode = #tpu.pipeline_mode<synchronous>, transform_indices = @transform_2, window_bounds = array<i64: 1, 32>}, {pipeline_mode = #tpu.pipeline_mode<synchronous>, transform_indices = @transform_3, window_bounds = array<i64: 32, 16>}, {pipeline_mode = #tpu.pipeline_mode<synchronous>, transform_indices = @transform_4, window_bounds = array<i64: 1, 16>}, {transform_indices = @transform_5, window_bounds = array<i64: 1, 16, 128>}]} {
    %c0 = arith.constant 0 : index
    %c0_0 = arith.constant 0 : index
    %c0_1 = arith.constant 0 : index
    %0 = vector.load %arg1[%c0, %c0_0, %c0_1] : memref<1x16x128xf32, #tpu.memory_space<vmem>>, vector<1x16x128xf32>
    %cst = arith.constant dense<0.000000e+00> : vector<1x16xf32>
    %1 = vector.multi_reduction <add>, %0, %cst [2] : vector<1x16x128xf32> to vector<1x16xf32>
    %cst_2 = arith.constant 7.812500e-03 : f32
    %2 = vector.broadcast %cst_2 : f32 to vector<1x16xf32>
    %3 = arith.mulf %1, %2 : vector<1x16xf32>
    %c0_3 = arith.constant 0 : index
    %c0_4 = arith.constant 0 : index
    %4 = vector.load %arg2[%c0_3, %c0_4] : memref<16x32xf32, #tpu.memory_space<vmem>>, vector<16x32xf32>
    %cst_5 = arith.constant dense<0.000000e+00> : vector<1x32xf32>
    %5 = tpu.matmul %3, %4, %cst_5 {dimension_numbers = #tpu.dot_dimension_numbers<[1], [0], [0], [1], [0, 0, 1, 1], [], []>} : vector<1x16xf32>, vector<16x32xf32>, vector<1x32xf32> -> vector<1x32xf32>
    %c0_6 = arith.constant 0 : index
    %c0_7 = arith.constant 0 : index
    %6 = vector.load %arg3[%c0_6, %c0_7] : memref<1x32xf32, #tpu.memory_space<vmem>>, vector<1x32xf32>
    %7 = arith.addf %5, %6 : vector<1x32xf32>
    %cst_8 = arith.constant 0.000000e+00 : f32
    %8 = vector.broadcast %cst_8 : f32 to vector<1x32xf32>
    %9 = arith.maximumf %7, %8 : vector<1x32xf32>
    %c0_9 = arith.constant 0 : index
    %c0_10 = arith.constant 0 : index
    %10 = vector.load %arg4[%c0_9, %c0_10] : memref<32x16xf32, #tpu.memory_space<vmem>>, vector<32x16xf32>
    %cst_11 = arith.constant dense<0.000000e+00> : vector<1x16xf32>
    %11 = tpu.matmul %9, %10, %cst_11 {dimension_numbers = #tpu.dot_dimension_numbers<[1], [0], [0], [1], [0, 0, 1, 1], [], []>} : vector<1x32xf32>, vector<32x16xf32>, vector<1x16xf32> -> vector<1x16xf32>
    %c0_12 = arith.constant 0 : index
    %c0_13 = arith.constant 0 : index
    %12 = vector.load %arg5[%c0_12, %c0_13] : memref<1x16xf32, #tpu.memory_space<vmem>>, vector<1x16xf32>
    %13 = arith.addf %11, %12 : vector<1x16xf32>
    %14 = arith.negf %13 : vector<1x16xf32>
    %15 = math.exp %14 : vector<1x16xf32>
    %cst_14 = arith.constant 1.000000e+00 : f32
    %16 = vector.broadcast %cst_14 : f32 to vector<1x16xf32>
    %17 = arith.addf %16, %15 : vector<1x16xf32>
    %18 = arith.divf %16, %17 : vector<1x16xf32>
    %c0_15 = arith.constant 0 : index
    %c0_16 = arith.constant 0 : index
    %c0_17 = arith.constant 0 : index
    %19 = vector.load %arg1[%c0_15, %c0_16, %c0_17] : memref<1x16x128xf32, #tpu.memory_space<vmem>>, vector<1x16x128xf32>
    %20 = vector.shape_cast %18 : vector<1x16xf32> to vector<1x16x1xf32>
    %21 = vector.broadcast %20 : vector<1x16x1xf32> to vector<1x16x128xf32>
    %22 = arith.mulf %19, %21 : vector<1x16x128xf32>
    %c0_18 = arith.constant 0 : index
    %c0_19 = arith.constant 0 : index
    %c0_20 = arith.constant 0 : index
    %23 = vector.load %arg6[%c0_18, %c0_19, %c0_20] : memref<1x16x128xf32, #tpu.memory_space<vmem>>, vector<1x16x128xf32>
    tpu.vector_store %arg6[%c0_18, %c0_19, %c0_20], %22 {strides = array<i32>} : memref<1x16x128xf32, #tpu.memory_space<vmem>>, vector<1x16x128xf32>,
    return
  }
  func.func @transform_0(%arg0: i32) -> (i32, i32, i32) {
    %c0_i32 = arith.constant 0 : i32
    %c0_i32_0 = arith.constant 0 : i32
    %c0_i32_1 = arith.constant 0 : i32
    return %arg0, %c0_i32, %c0_i32_0 : i32, i32, i32
  }
  func.func @transform_1(%arg0: i32) -> (i32, i32) {
    %c0_i32 = arith.constant 0 : i32
    %c0_i32_0 = arith.constant 0 : i32
    %c0_i32_1 = arith.constant 0 : i32
    return %c0_i32, %c0_i32_0 : i32, i32
  }
  func.func @transform_2(%arg0: i32) -> (i32, i32) {
    %c0_i32 = arith.constant 0 : i32
    %c0_i32_0 = arith.constant 0 : i32
    %c0_i32_1 = arith.constant 0 : i32
    return %c0_i32, %c0_i32_0 : i32, i32
  }
  func.func @transform_3(%arg0: i32) -> (i32, i32) {
    %c0_i32 = arith.constant 0 : i32
    %c0_i32_0 = arith.constant 0 : i32
    %c0_i32_1 = arith.constant 0 : i32
    return %c0_i32, %c0_i32_0 : i32, i32
  }
  func.func @transform_4(%arg0: i32) -> (i32, i32) {
    %c0_i32 = arith.constant 0 : i32
    %c0_i32_0 = arith.constant 0 : i32
    %c0_i32_1 = arith.constant 0 : i32
    return %c0_i32, %c0_i32_0 : i32, i32
  }
  func.func @transform_5(%arg0: i32) -> (i32, i32, i32) {
    %c0_i32 = arith.constant 0 : i32
    %c0_i32_0 = arith.constant 0 : i32
    %c0_i32_1 = arith.constant 0 : i32
    return %arg0, %c0_i32, %c0_i32_0 : i32, i32, i32
  }
}

</mosaic_0001>

<bundles_post_ra>
// kernel: tpu_custom_call.1
= control target key start
LH: loop header
LB: loop body
LE: loop exit
PB: predicated region body
PF: predicated region fallthrough
CT: control target
= control target key end

     0   :  { %10 = vsyncpa [#allocation3], 0  ;;  %s834_s0 = inlined_call_operand.vmem [shape: f32[2,16,128], index: 0, kind: input, shape index: {}]   ;;  %s835_s1 = inlined_call_operand.vmem [shape: f32[16,32], index: 1, kind: input, shape index: {}]   ;;  %s836_s2 = inlined_call_operand.vmem [shape: f32[1,32], index: 2, kind: input, shape index: {}]   ;;  %s837_s3 = inlined_call_operand.vmem [shape: f32[32,16], index: 3, kind: input, shape index: {}]   ;;  %s838_s4 = inlined_call_operand.vmem [shape: f32[1,16], index: 4, kind: input, shape index: {}]   ;;  %s839_s5 = inlined_call_operand.hbm [shape: f32[2,16,128], index: 5, kind: output, shape index: {}]  }
   0x1   :  { %12 = vsyncpa [#allocation3 + $0x1], 0  ;;  %s699_s18 = smov 0   ;;  %s701_s19 = smov 0  }
   0x2   :  { %s703_s20 = smov 0   ;;  %s705_s21 = smov 0  }
   0x3 LB: > { %s720_s22 = sadd.s32 4294967295, %s661_s21   ;;  %s499_s23 = sadd.s32 4294967294, %s661_s21   ;;  %s661_s21 = sphi %s705_s21, %s845_s21   ;;  %s657_s20 = sphi %s703_s20, %s844_s20   ;;  %s653_s19 = sphi %s701_s19, %s843_s19   ;;  %s649_s18 = sphi %s699_s18, %s842_s18  }
   0x4   : > { %s724_s24 = sadd.s32 1, %s661_s21   ;;  %s135_s25 = sadd.s32 1, %s657_s20 }
   0x5   : > { %s132_s26 = ssub.s32 %s661_s21, %s724_s24  ;;  %p145_p0 = scmp.ne.s32.totalorder %s657_s20, %s653_s19 }
   0x6   : > { %p133_p1 = scmp.eq.s32.totalorder %s132_s26, 0  ;;  %p146_p2 = scmp.eq.s32.totalorder %s720_s22, 1 }
   0x7   : > { %p151_p3 = scmp.ne.s32.totalorder %s653_s19, %s649_s18  ;;  %p152_p4 = scmp.eq.s32.totalorder %s499_s23, 1 }
   0x8   : > { %s735_s27 = scalar_select %p133_p1, %s657_s20, %s135_s25  }
   0x9   : > { %p737_p5 = por %p146_p2, %p145_p0  ;;  %p741_p6 = por %p152_p4, %p151_p3 }
   0xa   : > { %p502_p7 = scmp.ge.s32.totalorder %s661_s21, 1  ;;  %p190_p8 = scmp.lt.s32.totalorder %s661_s21, 3 }
   0xc   : > { %p191_p9 = pnand %p502_p7, %p190_p8 }
   0xd   : > { %p218_p10 = scmp.lt.s32.totalorder (!%p191_p9), %s720_s22, 1  ;;  %v231_v2 = vld [vmem:[%s835_s1] sm:$0xff] (!%p191_p9)  ;;  %v232_v3 = vld [vmem:[%s835_s1 + $0x8] sm:$0xff] (!%p191_p9)  ;;  %v663_v5 = vmov (!%p191_p9), 0.0|0.0   ;;  %vm664_vm0 = vmmov (!%p191_p9), 0   ;;  %v665_v6 = vmov (!%p191_p9), 0.0   ;;  %v236_v10 = vlaneseq (!%p191_p9) }
   0xe   : > { %194 = sbr.rel (%p191_p9) target bundleno = 771 (0x303), region = 40  ;;  %v543_v4 = vpack.c.bf16 (!%p191_p9), %v232_v3, %v231_v2  ;;  %542 = vmatprep.subr.bf16.mxu0 (!%p191_p9), %v663_v5  ;;  %545 = vmatprep.subr.bf16.mxu1 (!%p191_p9), %v663_v5  ;;  %v323_v7 = vld [vmem:[%s837_s3] sm:$0xff] (!%p191_p9)  ;;  %v324_v8 = vld [vmem:[%s837_s3 + $0x8] sm:$0xff] (!%p191_p9)  ;;  %vm247_vm1 = vcmask (!%p191_p9), 130112   ;;  %vm249_vm2 = vcmask (!%p191_p9), 130048   ;;  %v325_v23 = vld [vmem:[%s837_s3 + $0x10] sm:$0xff] (!%p191_p9) }
   0xf   : > { %528 = vmatprep.mubr.msk.f32.mxu0 (!%p191_p9), %vm664_vm0, %v665_v6  ;;  %539 = vmatprep.mubr.msk.f32.mxu1 (!%p191_p9), %vm664_vm0, %v665_v6  ;;  %v546_v9 = vpack.c.bf16 (!%p191_p9), %v324_v8, %v323_v7  ;;  %v237_v11 = vand.u32 (!%p191_p9), 127, %v236_v10  ;;  %v239_v12 = vshrl.u32 (!%p191_p9), %v236_v10, 7  ;;  %v326_v24 = vld [vmem:[%s837_s3 + $0x18] sm:$0xff] (!%p191_p9)  ;;  %v233_v26 = vld [vmem:[%s836_s2] sm:$0x1] (!%p191_p9)  ;;  %vm328_vm3 = vcmask (!%p191_p9), 261120  }
  0x10   : > { %544 = vmatpush3.bf16.msra.mxu0 (!%p191_p9), %v543_v4  ;;  %v549_v25 = vpack.c.bf16 (!%p191_p9), %v326_v24, %v325_v23  ;;  %v327_v31 = vld [vmem:[%s838_s4] sm:$0x1] (!%p191_p9)  ;;  %s215_s10 = sand.u32 (!%p191_p9), 1, %s653_s19   ;;  %s515_s14 = sshll.u32 (!%p191_p9), %s720_s22, 8 }
  0x11   : > { %547 = vmatpush3.bf16.msra.mxu1 (!%p191_p9), %v546_v9  ;;  %v242_v13 = vadd.s32 (!%p191_p9), 4294967288, %v237_v11  ;;  %v240_v15 = vsub.s32 (!%p191_p9), %v237_v11, %v239_v12  ;;  %v410_v38 = vsub.s32 (!%p191_p9), 0, %v239_v12  ;;  %s503_s11 = sshll.u32 (!%p191_p9), %s215_s10, 4  ;;  %s790_s17 = scalar_lea.hbm (!%p191_p9), %s839_s5, %s515_s14 }
  0x12   : > { %548 = vmatprep.subr.bf16.mxu1 (!%p191_p9), %v663_v5  ;;  %s217_s12 = scalar_lea.vmem (!%p191_p9), [#allocation2], %s503_s11  ;;  %s793_s23 = scalar_lea.sflag (!%p191_p9), [#allocation3], %s215_s10 }
  0x13   : > { %v245_v17 = vsub.s32 (!%p191_p9), %v242_v13, %v239_v12  ;;  %s437_s13 = sshll.u32 (!%p191_p9), %s217_s12, 4  ;;  %s785_s13 = int_to_ptr.vmem [resolvable:$true] %s437_s13 }
  0x14   : > { %s599_s25 = scalar_lea.vmem (!%p191_p9), %s785_s13, 256 }
  0x15   : > { %s219_s30 = scalar_select %p218_p10, %s720_s22, 1  ;;  %550 = vmatpush3.bf16.msra.mxu1 %v549_v25 }
  0x16   : > { %p600_p11 = scmp.ne.s32.totalorder %s785_s13, %s599_s25  ;;  %s666_s22 = smov [#allocation2]  }
  0x17   : > { %s514_s6 = sshll.u32 %s219_s30, 4  ;;  %s603_s26 = sshll.u32 %s666_s22, 4  ;;  %s604_s26 = int_to_ptr.vmem [resolvable:$false] %s603_s26 }
  0x18   : > { %s222_s9 = scalar_lea.vmem %s834_s0, %s514_s6  ;;  %p601_p12 = pnand %p600_p11, %p737_p5 }
  0x19   : > { %v752_v0 = vld [vmem:[%s222_s9] sm:$0xff]  ;;  %v755_v1 = vld [vmem:[%s222_s9 + $0x8] sm:$0xff]  ;;  %s605_s30 = scalar_lea.vmem %s604_s26, 512  ;;  %p606_p0 = scmp.lt.s32.totalorder %s785_s13, %s604_s26 }
  0x1a   : > { %225 = vadd.xlane.f32.xlu0 %v752_v0  ;;  %p602_p13 = pneg %p601_p12  ;;  %p607_p1 = scmp.lt.s32.totalorder %s605_s30, %s599_s25 }
  0x1c   : > { %p608_p2 = por %p607_p1, %p606_p0 }
  0x1e   : > { %227 = vadd.xlane.f32.xlu0 %v755_v1  ;;  %p609_p3 = pnand %p608_p2, %p602_p13 }
  0xa7   : > { %v226_v14 = vpop.xlane.xlu0 %225 }
  0xa8   : > { %v229_v16 = vmul.f32 0.0078125, %v226_v14 }
  0xaa   : > { %v241_v20 = vrot.slane %v229_v16, %v240_v15 }
  0xab   : > { %v228_v18 = vpop.xlane.xlu0 %227 }
  0xac   : > { %v230_v19 = vmul.f32 0.0078125, %v228_v18 }
  0xae   : > { %v246_v21 = vrot.slane %v230_v19, %v245_v17 }
  0xb0   : > { %v248_v22 = vsel %vm247_vm1, %v246_v21, %v241_v20 }
  0xb1   : > { %529 = vmatmul.mubr.msk.f32.vlgmr.msra.gmra.mrb[0].mxu0 %vm249_vm2, %v248_v22 }
 0x184   : > { %v318_v27 = vpop.f32.mrb[0].mxu0 }
 0x185   : > { %v319_v28 = vadd.f32 %v318_v27, %v233_v26  ;;  %v530_v29 = vpop.f32.mrb[1].mxu0 }
 0x187   : > { %v322_v30 = vmax.f32 %v319_v28, 0.0 }
 0x189   : > { %540 = vmatmul.mubr.msk.f32.vlgmr.msra.gmra.mrb[0].mxu1 %vm328_vm3, %v322_v30 }
 0x25c   : > { %v398_v32 = vpop.f32.mrb[0].mxu1 }
 0x25d   : > { %v399_v33 = vadd.f32 %v398_v32, %v327_v31  ;;  %v541_v34 = vpop.f32.mrb[1].mxu1 }
 0x25f   : > { %v508_v35 = vmul.f32 -1.442695, %v399_v33 }
 0x261   : > { %595 = vpow2.f32 %v508_v35 }
 0x26b   : > { %v596_v36 = vpop.eup %595 }
 0x26c   : > { %v405_v37 = vadd.f32 1.0, %v596_v36 }
 0x26e   : > { %597 = vrcp.f32 %v405_v37 }
 0x278   : > { %v598_v39 = vpop.eup %597 }
 0x279   : > { %v411_v40 = vrot.slane %v598_v39, %v410_v38 }
 0x27b   : > { %413 = vbcast.lane.b32.xlu1 %v411_v40, 256 }
 0x27f   : > { %417 = vbcast.lane.b32.xlu1 %v411_v40, 264 }
 0x2ed   : > { %v414_v41 = vpop.permute.xlu1 %413 }
 0x2ee   : > { %v419_v42 = vmul.f32 %v414_v41, %v752_v0 }
 0x2f0   : > { %421 = vst [vmem:[%s217_s12] sm:$0xff] %v419_v42 }
 0x2f1   : > { %v418_v43 = vpop.permute.xlu1 %417 }
 0x2f2   : > { %v420_v44 = vmul.f32 %v418_v43, %v755_v1 }
 0x2f4   : > { %422 = vst [vmem:[%s217_s12 + $0x8] sm:$0xff] %v420_v44 }
 0x2f5   : > { %612 = shalt.err (!%p609_p3)
}
 0x2f6   : > { %s613_s6 = scalar_lea.hbm %s790_s17, 256  ;;  %s617_s9 = scalar_lea.hbm %s839_s5, 512 }
 0x2f7   : > { %p614_p4 = scmp.ne.s32.totalorder %s790_s17, %s613_s6  ;;  %p618_p9 = scmp.lt.u32.totalorder %s790_s17, %s839_s5 }
 0x2f8   : > { %p619_p10 = scmp.lt.u32.totalorder %s617_s9, %s613_s6  ;;  %p621_p12 = scmp.lt.u32.totalorder %s613_s6, %s790_s17 }
 0x2f9   : > { %p615_p7 = pnand %p614_p4, %p737_p5 }
 0x2fa   : > { %p620_p11 = por %p619_p10, %p618_p9 }
 0x2fb   : > { %p616_p8 = pneg %p615_p7 }
 0x2fc   : > { %p622_p13 = por %p621_p12, %p620_p11 }
 0x2fe   : > { %p623_p0 = pnand %p622_p13, %p616_p8 }
 0x300   : > { %626 = shalt.err (!%p623_p0)
}
 0x301   : > { %s667_s12 = smov 128   ;;  %s668_s14 = smov 8  }
 0x302   : > { %551 = dma.vmem_to_hbm [thread:$0]  (%p737_p5), %s785_s13, 256, %s790_s17, %s793_s23, %s667_s12, %s667_s12, %s668_s14  }
 0x303 PF: > { %p557_p1 = scmp.ge.s32.totalorder %s661_s21, 2  ;;  %s452_s15 = sand.u32 1, %s649_s18  }
 0x304   : > { %s453_s16 = scalar_lea.sflag [#allocation3], %s452_s15 }
 0x305   : > { %p554_p2 = pnand %p557_p1, %p741_p6 }
 0x307   : > { %644 = dma.done.wait (!%p554_p2), %s453_s16, 256  }
 0x308   : > { %646 = vsyncadd (!%p554_p2), %s453_s16, 4294967040  ;;  %p15_p3 = scmp.ge.s32.totalorder %s724_s24, 4   ;;  %s842_s18 = smov %s653_s19 }
 0x309   : > { %s843_s19 = smov %s657_s20  ;;  %s844_s20 = smov %s735_s27 }
 0x30a   : > { %s845_s21 = smov %s724_s24  ;;  %17 = sbr.rel (!%p15_p3) target bundleno = 3 (0x3), region = 75 }
 0x311   :  { %458 = vsyncpa [#allocation3], 1 }
 0x312   :  { %460 = vsyncpa [#allocation3 + $0x1], 1 }

</bundles_post_ra>
